<compile_context>
chip_gen: v7x
topology: tpu7x:2x2x1
jax: 0.10.0
libtpu: 0.0.40
codegen_flags: <defaults>
</compile_context>

<pallas_src>
import jax
import jax.numpy as jnp
from jax.experimental import pallas as pl
from jax.experimental.pallas import tpu as pltpu


_VMEM_LIMIT_BYTES = 48 * 1024 * 1024   # headroom on 64 MiB (v7x) and 128 MiB VMEM
_TILE_BYTES_TARGET = 4 * 1024 * 1024   # ~4 MiB per streaming block per buffer


def _divisors(n):
    ds = set()
    i = 1
    while i * i <= n:
        if n % i == 0:
            ds.add(i)
            ds.add(n // i)
        i += 1
    return sorted(ds)


def _choose_lanes(rows_per_channel, channels, max_lanes=2048, target_lanes=1024):
    """Pick lane width L = g*C with g | (N*H*W) so the last dim is dense.

    Prefer L a multiple of 128 (full vregs, unmasked vst); fall back to any
    L >= 128, and finally to L = C for degenerate shapes.
    """
    aligned, wide = [], []
    for g in _divisors(rows_per_channel):
        lanes = g * channels
        if lanes > max_lanes:
            continue
        if lanes % 128 == 0:
            aligned.append(lanes)
        elif lanes >= 128:
            wide.append(lanes)
    if aligned:
        under = [l for l in aligned if l <= target_lanes]
        return max(under) if under else min(aligned)
    if wide:
        return max(wide)
    return channels


def _choose_tile_rows(n_rows, lanes, itemsize):
    """Largest row tile dividing n_rows that obeys the (8,128) block rule and
    stays under the per-buffer byte target (chosen at trace time, no tail)."""
    budget_rows = max(1, _TILE_BYTES_TARGET // (lanes * itemsize))
    best = None
    for d in _divisors(n_rows):
        if d > budget_rows:
            continue
        if d % 8 == 0 or d == n_rows:
            if best is None or d > best:
                best = d
    return best if best is not None else n_rows


def _stats_kernel(x_ref, sum_ref, sq_ref):
    """Pass 1: accumulate per-lane sum / sum-of-squares across row tiles."""
    @pl.when(pl.program_id(1) == 0)
    def _():
        sum_ref[...] = jnp.zeros_like(sum_ref)
        sq_ref[...] = jnp.zeros_like(sq_ref)

    x = x_ref[...].astype(jnp.float32)
    sum_ref[...] += jnp.sum(x, axis=0, keepdims=True)[None]
    sq_ref[...] += jnp.sum(x * x, axis=0, keepdims=True)[None]


def _apply_kernel(scale_ref, bias_ref, x_ref, o_ref):
    """Pass 2: out = x * scale + bias with pre-folded per-lane scale/bias."""
    x = x_ref[...].astype(jnp.float32)
    o_ref[...] = (x * scale_ref[...] + bias_ref[...]).astype(o_ref.dtype)


def norm2d_batch(x, *, eps=1e-10):
    """x: (N, H, W, C) -> (N, H, W, C); BatchNorm2d(training, affine=False)."""
    N, H, W, C = x.shape
    rows_per_channel = N * H * W

    # Lane-dense view: (n_rows, lanes) with lanes % C == 0, so column j is
    # channel j % C and no data transpose is required — only a reshape.
    lanes = _choose_lanes(rows_per_channel, C)
    group = lanes // C
    n_rows = (rows_per_channel * C) // lanes
    xf = x.reshape(n_rows, lanes)

    tile_rows = _choose_tile_rows(n_rows, lanes, x.dtype.itemsize)
    n_tiles = n_rows // tile_rows
    # Leading "parallel" split so the pass-1 reduction can use both
    # TensorCores on v7x-class chips (harmless on single-TC v5e/v6e).
    num_splits = 2 if (n_tiles >= 2 and n_tiles % 2 == 0) else 1
    tiles_per_split = n_tiles // num_splits

    stream_mode_p1 = pl.Buffered(3) if tiles_per_split >= 3 else None
    sums, sqs = pl.pallas_call(
        _stats_kernel,
        out_shape=(
            jax.ShapeDtypeStruct((num_splits, 1, lanes), jnp.float32),
            jax.ShapeDtypeStruct((num_splits, 1, lanes), jnp.float32),
        ),
        grid=(num_splits, tiles_per_split),
        in_specs=[
            pl.BlockSpec(
                (tile_rows, lanes),
                lambda s, j: (s * tiles_per_split + j, 0),
                pipeline_mode=stream_mode_p1,
            ),
        ],
        out_specs=(
            pl.BlockSpec((1, 1, lanes), lambda s, j: (s, 0, 0)),
            pl.BlockSpec((1, 1, lanes), lambda s, j: (s, 0, 0)),
        ),
        compiler_params=pltpu.CompilerParams(
            dimension_semantics=("parallel", "arbitrary"),
            vmem_limit_bytes=_VMEM_LIMIT_BYTES,
        ),
    )(xf)

    # Tiny per-channel statistics + scale/bias fold, once, in plain JAX
    # (keeps divide / rsqrt out of the hot streaming pass).
    count = float(rows_per_channel)
    sum_c = sums.sum(axis=(0, 1)).reshape(group, C).sum(axis=0)
    sq_c = sqs.sum(axis=(0, 1)).reshape(group, C).sum(axis=0)
    mean = sum_c / count
    var = sq_c / count - mean * mean          # biased variance (training mode)
    var = jnp.maximum(var, 0.0)               # guard E[x^2]-E[x]^2 cancellation
    scale = jax.lax.rsqrt(var + eps)
    bias = -mean * scale
    scale_l = jnp.tile(scale, group).reshape(1, lanes)
    bias_l = jnp.tile(bias, group).reshape(1, lanes)

    stream_mode_p2 = pl.Buffered(3) if n_tiles >= 3 else None
    out = pl.pallas_call(
        _apply_kernel,
        out_shape=jax.ShapeDtypeStruct((n_rows, lanes), x.dtype),
        grid=(n_tiles,),
        in_specs=[
            pl.BlockSpec((1, lanes), lambda i: (0, 0)),
            pl.BlockSpec((1, lanes), lambda i: (0, 0)),
            pl.BlockSpec((tile_rows, lanes), lambda i: (i, 0),
                         pipeline_mode=stream_mode_p2),
        ],
        out_specs=pl.BlockSpec((tile_rows, lanes), lambda i: (i, 0)),
        compiler_params=pltpu.CompilerParams(
            dimension_semantics=("parallel",),
            vmem_limit_bytes=_VMEM_LIMIT_BYTES,
        ),
    )(scale_l, bias_l, xf)

    return out.reshape(N, H, W, C)


def _reference(x, eps=1e-10):
    # Pure-JAX reference of BatchNorm2d(training, affine=False) on NHWC input.
    xf = x.astype(jnp.float32)
    mean = jnp.mean(xf, axis=(0, 1, 2), keepdims=True)
    var = jnp.mean((xf - mean) ** 2, axis=(0, 1, 2), keepdims=True)  # biased
    return ((xf - mean) / jnp.sqrt(var + eps)).astype(x.dtype)


if __name__ == "__main__":
    # Small NHWC input consistent with the module.
    N, H, W, C = 2, 16, 16, 4
    key = jax.random.PRNGKey(0)
    x = jax.random.normal(key, (N, H, W, C), dtype=jnp.float32) * 3.0 + 1.5

    y = jax.block_until_ready(norm2d_batch(x))

    y_ref = _reference(x)
    assert y.shape == (N, H, W, C)
    assert jnp.allclose(y, y_ref, atol=1e-4, rtol=1e-4), "mismatch vs reference"

    print("KERNEL_OK")
</pallas_src>

<mosaic_0001>
module attributes {stable_mosaic.version = 11 : i64} {
  func.func @_stats_kernel(%arg0: i32, %arg1: i32, %arg2: memref<2x1024xf32, #tpu.memory_space<vmem>>, %arg3: memref<1x1x1024xf32, #tpu.memory_space<vmem>>, %arg4: memref<1x1x1024xf32, #tpu.memory_space<vmem>>) attributes {dimension_semantics = [#tpu.dimension_semantics<parallel>, #tpu.dimension_semantics<arbitrary>], iteration_bounds = array<i64: 1, 1>, scalar_prefetch = 0 : i64, scratch_operands = 0 : i64, tpu.core_type = #tpu.core_type<tc>, window_params = [{transform_indices = @transform_0, window_bounds = array<i64: 2, 1024>}, {transform_indices = @transform_1, window_bounds = array<i64: 1, 1, 1024>}, {transform_indices = @transform_2, window_bounds = array<i64: 1, 1, 1024>}]} {
    %c0_i32 = arith.constant 0 : i32
    %0 = arith.cmpi eq, %arg1, %c0_i32 : i32
    %1 = arith.extui %0 : i1 to i32
    %c0_i32_0 = arith.constant 0 : i32
    %2 = arith.cmpi ne, %1, %c0_i32_0 : i32
    scf.if %2 {
      %cst_15 = arith.constant 0.000000e+00 : f32
      %17 = vector.broadcast %cst_15 : f32 to vector<1x1x1024xf32>
      %c0_16 = arith.constant 0 : index
      %c0_17 = arith.constant 0 : index
      %c0_18 = arith.constant 0 : index
      %18 = vector.load %arg3[%c0_16, %c0_17, %c0_18] : memref<1x1x1024xf32, #tpu.memory_space<vmem>>, vector<1x1x1024xf32>
      tpu.vector_store %arg3[%c0_16, %c0_17, %c0_18], %17 {strides = array<i32>} : memref<1x1x1024xf32, #tpu.memory_space<vmem>>, vector<1x1x1024xf32>,
      %cst_19 = arith.constant 0.000000e+00 : f32
      %19 = vector.broadcast %cst_19 : f32 to vector<1x1x1024xf32>
      %c0_20 = arith.constant 0 : index
      %c0_21 = arith.constant 0 : index
      %c0_22 = arith.constant 0 : index
      %20 = vector.load %arg4[%c0_20, %c0_21, %c0_22] : memref<1x1x1024xf32, #tpu.memory_space<vmem>>, vector<1x1x1024xf32>
      tpu.vector_store %arg4[%c0_20, %c0_21, %c0_22], %19 {strides = array<i32>} : memref<1x1x1024xf32, #tpu.memory_space<vmem>>, vector<1x1x1024xf32>,
    } else {
    }
    %c0 = arith.constant 0 : index
    %c0_1 = arith.constant 0 : index
    %3 = vector.load %arg2[%c0, %c0_1] : memref<2x1024xf32, #tpu.memory_space<vmem>>, vector<2x1024xf32>
    %c0_2 = arith.constant 0 : index
    %c0_3 = arith.constant 0 : index
    %c0_4 = arith.constant 0 : index
    %4 = vector.load %arg3[%c0_2, %c0_3, %c0_4] : memref<1x1x1024xf32, #tpu.memory_space<vmem>>, vector<1x1x1024xf32>
    %cst = arith.constant dense<0.000000e+00> : vector<1024xf32>
    %5 = vector.multi_reduction <add>, %3, %cst [0] : vector<2x1024xf32> to vector<1024xf32>
    %6 = vector.shape_cast %5 : vector<1024xf32> to vector<1x1024xf32>
    %7 = vector.shape_cast %6 : vector<1x1024xf32> to vector<1x1x1024xf32>
    %8 = arith.addf %4, %7 : vector<1x1x1024xf32>
    %c0_5 = arith.constant 0 : index
    %c0_6 = arith.constant 0 : index
    %c0_7 = arith.constant 0 : index
    %9 = vector.load %arg3[%c0_5, %c0_6, %c0_7] : memref<1x1x1024xf32, #tpu.memory_space<vmem>>, vector<1x1x1024xf32>
    tpu.vector_store %arg3[%c0_5, %c0_6, %c0_7], %8 {strides = array<i32>} : memref<1x1x1024xf32, #tpu.memory_space<vmem>>, vector<1x1x1024xf32>,
    %c0_8 = arith.constant 0 : index
    %c0_9 = arith.constant 0 : index
    %c0_10 = arith.constant 0 : index
    %10 = vector.load %arg4[%c0_8, %c0_9, %c0_10] : memref<1x1x1024xf32, #tpu.memory_space<vmem>>, vector<1x1x1024xf32>
    %11 = arith.mulf %3, %3 : vector<2x1024xf32>
    %cst_11 = arith.constant dense<0.000000e+00> : vector<1024xf32>
    %12 = vector.multi_reduction <add>, %11, %cst_11 [0] : vector<2x1024xf32> to vector<1024xf32>
    %13 = vector.shape_cast %12 : vector<1024xf32> to vector<1x1024xf32>
    %14 = vector.shape_cast %13 : vector<1x1024xf32> to vector<1x1x1024xf32>
    %15 = arith.addf %10, %14 : vector<1x1x1024xf32>
    %c0_12 = arith.constant 0 : index
    %c0_13 = arith.constant 0 : index
    %c0_14 = arith.constant 0 : index
    %16 = vector.load %arg4[%c0_12, %c0_13, %c0_14] : memref<1x1x1024xf32, #tpu.memory_space<vmem>>, vector<1x1x1024xf32>
    tpu.vector_store %arg4[%c0_12, %c0_13, %c0_14], %15 {strides = array<i32>} : memref<1x1x1024xf32, #tpu.memory_space<vmem>>, vector<1x1x1024xf32>,
    return
  }
  func.func @transform_0(%arg0: i32, %arg1: i32) -> (i32, i32) {
    %c1_i32 = arith.constant 1 : i32
    %0 = arith.muli %arg0, %c1_i32 : i32
    %1 = arith.addi %0, %arg1 : i32
    %c0_i32 = arith.constant 0 : i32
    %c0_i32_0 = arith.constant 0 : i32
    return %1, %c0_i32 : i32, i32
  }
  func.func @transform_1(%arg0: i32, %arg1: i32) -> (i32, i32, i32) {
    %c0_i32 = arith.constant 0 : i32
    %c0_i32_0 = arith.constant 0 : i32
    %c0_i32_1 = arith.constant 0 : i32
    return %arg0, %c0_i32, %c0_i32_0 : i32, i32, i32
  }
  func.func @transform_2(%arg0: i32, %arg1: i32) -> (i32, i32, i32) {
    %c0_i32 = arith.constant 0 : i32
    %c0_i32_0 = arith.constant 0 : i32
    %c0_i32_1 = arith.constant 0 : i32
    return %arg0, %c0_i32, %c0_i32_0 : i32, i32, i32
  }
}

</mosaic_0001>

<bundles_post_ra>
// kernel: tpu_custom_call.1
= control target key start
LH: loop header
LB: loop body
LE: loop exit
PB: predicated region body
PF: predicated region fallthrough
CT: control target
= control target key end

     0   :  { %8 = vsyncpa [#allocation3], 0  ;;  %s577_s0 = inlined_call_operand.hbm [shape: f32[2,1024], index: 0, kind: input, shape index: {}]   ;;  %s578_s1 = inlined_call_operand.hbm [shape: f32[1,1,1024], index: 1, kind: output, shape index: {0}]   ;;  %s579_s2 = inlined_call_operand.hbm [shape: f32[1,1,1024], index: 2, kind: output, shape index: {1}]  }
   0x1   :  { %9 = vsyncpa [#allocation4], 0 }
   0x2   :  { %10 = vsyncpa [#allocation7], 0  ;;  %s471_s9 = smov [#allocation2]   ;;  %s399_s13 = scalar_lea.hbm %s577_s0, 256 }
   0x3   :  { %s21_s10 = sshll.u32 %s471_s9, 4  ;;  %p400_p0 = scmp.ne.s32.totalorder %s577_s0, %s399_s13  ;;  %s22_s10 = int_to_ptr.vmem [resolvable:$true] %s21_s10 }
   0x4   :  { %p403_p1 = scmp.lt.u32.totalorder %s399_s13, %s577_s0 }
   0x6   :  { %p405_p2 = pnand %p403_p1, %p400_p0 }
   0x8   :  { %408 = shalt.err (!%p405_p2)
}
   0x9   :  { %s409_s18 = scalar_lea.vmem %s22_s10, 256  ;;  %p414_p4 = scmp.lt.s32.totalorder %s22_s10, %s22_s10 }
   0xa   :  { %p410_p3 = scmp.ne.s32.totalorder %s22_s10, %s409_s18  ;;  %p415_p5 = scmp.lt.s32.totalorder %s409_s18, %s409_s18 }
   0xc   :  { %p416_p6 = por %p415_p5, %p414_p4 }
   0xe   :  { %p417_p7 = pnand %p416_p6, %p410_p3 }
  0x10   :  { %420 = shalt.err (!%p417_p7)
}
  0x11   :  { %24 = dma.hbm_to_vmem [thread:$0]  %s577_s0, 256, %s22_s10, [#allocation3]  }
  0x12   :  { %465 = dma.done.wait [#allocation3], 256  }
  0x13   :  { %466 = vsyncadd [#allocation3], 4294967040  ;;  %v44_v0 = vlaneseq  ;;  %v472_v1 = vmov 1983009808   ;;  %v473_v4 = vmov 1966171168  }
  0x14   :  { %v42_v2 = vunpack.c.l.s4 %v472_v1  ;;  %v152_v5 = vunpack.c.l.s4 %v473_v4  ;;  %v35_v9 = vld [vmem:[#allocation2] sm:$0xff]  ;;  %v36_v10 = vld [vmem:[#allocation2 + $0x8] sm:$0xff]  ;;  %vm82_vm0 = vcmask 1041408   ;;  %s474_s0 = smov [#allocation5]  }
  0x15   :  { %v45_v3 = vshrl.u32 %v44_v0, 7  ;;  %v40_v11 = vcombine.high %v35_v9, %v35_v9  ;;  %v57_v13 = vcombine.high %v36_v10, %v36_v10  ;;  %v200_v16 = vmul.f32 %v35_v9, %v35_v9  ;;  %s368_s21 = sshll.u32 %s474_s0, 4  ;;  %s369_s21 = int_to_ptr.vmem [resolvable:$true] %s368_s21 }
  0x16   :  { %v43_v6 = vunpack.c.0.s8 %v42_v2  ;;  %v153_v8 = vunpack.c.0.s8 %v152_v5  ;;  %v509_v17 = vmul.f32 %v36_v10, %v36_v10  ;;  %s421_s22 = scalar_lea.vmem %s369_s21, 128  ;;  %p426_p9 = scmp.lt.s32.totalorder %s369_s21, %s369_s21 }
  0x17   :  { %v204_v24 = vcombine.high %v200_v16, %v200_v16  ;;  %p422_p8 = scmp.ne.s32.totalorder %s369_s21, %s421_s22  ;;  %p427_p10 = scmp.lt.s32.totalorder %s421_s22, %s421_s22 }
  0x18   :  { %v503_v7 = vsub.s32 %v43_v6, %v45_v3  ;;  %v507_v15 = vsub.s32 %v153_v8, %v45_v3 }
  0x19   :  { %p428_p11 = por %p427_p10, %p426_p9 }
  0x1a   :  { %v47_v12 = vrot.slane %v35_v9, %v503_v7  ;;  %v64_v14 = vrot.slane %v36_v10, %v503_v7  ;;  %v54_v18 = vrot.slane %v40_v11, %v503_v7  ;;  %v71_v20 = vrot.slane %v57_v13, %v503_v7 }
  0x1b   :  { %v516_v25 = vrot.slane %v200_v16, %v503_v7  ;;  %p429_p12 = pnand %p428_p11, %p422_p8 }
  0x1c   :  { %v55_v19 = vcombine.high %v47_v12, %v47_v12  ;;  %v72_v21 = vcombine.high %v64_v14, %v64_v14  ;;  %v83_v22 = vsel %vm82_vm0, %v47_v12, 0.0  ;;  %v111_v23 = vsel %vm82_vm0, %v64_v14, 0.0 }
  0x1d   :  { %v56_v26 = vcombine.high %v54_v18, %v54_v18  ;;  %v73_v27 = vcombine.high %v71_v20, %v71_v20  ;;  %v84_v28 = vrot.slane %v83_v22, 4  ;;  %v97_v31 = vsel %vm82_vm0, %v54_v18, 0.0 }
  0x1e   :  { %v90_v29 = vsel %vm82_vm0, %v55_v19, 0.0  ;;  %v112_v32 = vrot.slane %v111_v23, 4  ;;  %v118_v33 = vsel %vm82_vm0, %v72_v21, 0.0  ;;  %v98_v35 = vrot.slane %v97_v31, 4 }
  0x1f   :  { %v91_v30 = vrot.slane %v90_v29, 4  ;;  %v85_v34 = vadd.f32 %v84_v28, %v83_v22  ;;  %v104_v36 = vsel %vm82_vm0, %v56_v26, 0.0  ;;  %v119_v37 = vrot.slane %v118_v33, 4 }
  0x20   :  { %v105_v39 = vrot.slane %v104_v36, 4  ;;  %v113_v40 = vadd.f32 %v112_v32, %v111_v23  ;;  %v125_v41 = vsel %vm82_vm0, %v71_v20, 0.0  ;;  %v99_v43 = vadd.f32 %v98_v35, %v97_v31 }
  0x21   :  { %v92_v38 = vadd.f32 %v91_v30, %v90_v29  ;;  %v86_v42 = vrot.slane %v85_v34, 2  ;;  %v120_v44 = vadd.f32 %v119_v37, %v118_v33  ;;  %v126_v45 = vrot.slane %v125_v41, 4 }
  0x22   :  { %v106_v47 = vadd.f32 %v105_v39, %v104_v36  ;;  %v114_v48 = vrot.slane %v113_v40, 2  ;;  %v132_v49 = vsel %vm82_vm0, %v73_v27, 0.0  ;;  %v100_v51 = vrot.slane %v99_v43, 2 }
  0x23   :  { %v93_v46 = vrot.slane %v92_v38, 2  ;;  %v87_v50 = vadd.f32 %v86_v42, %v85_v34  ;;  %v121_v52 = vrot.slane %v120_v44, 2  ;;  %v127_v53 = vadd.f32 %v126_v45, %v125_v41 }
  0x24   :  { %v107_v55 = vrot.slane %v106_v47, 2  ;;  %v115_v56 = vadd.f32 %v114_v48, %v113_v40  ;;  %v133_v57 = vrot.slane %v132_v49, 4  ;;  %v101_v59 = vadd.f32 %v100_v51, %v99_v43 }
  0x25   :  { %v94_v54 = vadd.f32 %v93_v46, %v92_v38  ;;  %v88_v58 = vrot.slane %v87_v50, 1  ;;  %v122_v60 = vadd.f32 %v121_v52, %v120_v44  ;;  %v128_v61 = vrot.slane %v127_v53, 2 }
  0x26   :  { %v108_v63 = vadd.f32 %v107_v55, %v106_v47  ;;  %v116_v0 = vrot.slane %v115_v56, 1  ;;  %v134_v1 = vadd.f32 %v133_v57, %v132_v49  ;;  %v102_v3 = vrot.slane %v101_v59, 1 }
  0x27   :  { %v95_v62 = vrot.slane %v94_v54, 1  ;;  %v89_v2 = vadd.f32 %v88_v58, %v87_v50  ;;  %v123_v4 = vrot.slane %v122_v60, 1  ;;  %v129_v5 = vadd.f32 %v128_v61, %v127_v53 }
  0x28   :  { %v109_v8 = vrot.slane %v108_v63, 1  ;;  %v117_v9 = vadd.f32 %v116_v0, %v115_v56  ;;  %v135_v10 = vrot.slane %v134_v1, 2  ;;  %v103_v11 = vadd.f32 %v102_v3, %v101_v59 }
  0x29   :  { %v96_v6 = vadd.f32 %v95_v62, %v94_v54  ;;  %v124_v12 = vadd.f32 %v123_v4, %v122_v60  ;;  %v130_v13 = vrot.slane %v129_v5, 1  ;;  %v218_v14 = vrot.slane %v204_v24, %v503_v7 }
  0x2a   :  { %v110_v16 = vadd.f32 %v109_v8, %v108_v63  ;;  %v136_v18 = vadd.f32 %v135_v10, %v134_v1  ;;  %v219_v20 = vcombine.high %v516_v25, %v516_v25  ;;  %v221_v26 = vcombine.high %v509_v17, %v509_v17 }
  0x2b   :  { %v147_v19 = vcombine.low %v89_v2, %v96_v6  ;;  %v131_v21 = vadd.f32 %v130_v13, %v129_v5  ;;  %v149_v22 = vcombine.low %v117_v9, %v124_v12  ;;  %v220_v23 = vcombine.high %v218_v14, %v218_v14 }
  0x2c   :  { %v137_v27 = vrot.slane %v136_v18, 1  ;;  %v148_v28 = vcombine.low %v103_v11, %v110_v16  ;;  %v228_v30 = vrot.slane %v509_v17, %v503_v7  ;;  %v235_v31 = vrot.slane %v221_v26, %v503_v7 }
  0x2d   :  { %v157_v29 = vrot.slane %v147_v19, %v507_v15  ;;  %v171_v24 = vrot.slane %v149_v22, %v507_v15  ;;  %v246_v32 = vsel %vm82_vm0, %v516_v25, 0.0  ;;  %v253_v33 = vsel %vm82_vm0, %v219_v20, 0.0 }
  0x2e   :  { %v138_v34 = vadd.f32 %v137_v27, %v136_v18  ;;  %v164_v35 = vrot.slane %v148_v28, %v507_v15  ;;  %v236_v36 = vcombine.high %v228_v30, %v228_v30  ;;  %v247_v37 = vrot.slane %v246_v32, 4 }
  0x2f   :  { %v237_v38 = vcombine.high %v235_v31, %v235_v31  ;;  %v254_v39 = vrot.slane %v253_v33, 4  ;;  %v260_v40 = vsel %vm82_vm0, %v218_v14, 0.0  ;;  %v267_v17 = vsel %vm82_vm0, %v220_v23, 0.0 }
  0x30   :  { %v150_v41 = vcombine.low %v131_v21, %v138_v34  ;;  %v179_v42 = vcombine.low %v157_v29, %v164_v35  ;;  %v248_v43 = vadd.f32 %v247_v37, %v246_v32  ;;  %v261_v7 = vrot.slane %v260_v40, 4 }
  0x31   :  { %v255_v44 = vadd.f32 %v254_v39, %v253_v33  ;;  %v268_v45 = vrot.slane %v267_v17, 4  ;;  %v274_v25 = vsel %vm82_vm0, %v228_v30, 0.0  ;;  %v281_v46 = vsel %vm82_vm0, %v236_v36, 0.0 }
  0x32   :  { %v178_v47 = vrot.slane %v150_v41, %v507_v15  ;;  %v187_v48 = vrot.slane %v179_v42, %v507_v15  ;;  %v249_v49 = vrot.slane %v248_v43, 2  ;;  %v262_v50 = vadd.f32 %v261_v7, %v260_v40 }
  0x33   :  { %v256_v51 = vrot.slane %v255_v44, 2  ;;  %v269_v52 = vadd.f32 %v268_v45, %v267_v17  ;;  %v275_v53 = vrot.slane %v274_v25, 4  ;;  %v282_v54 = vrot.slane %v281_v46, 4 }
  0x34   :  { %v180_v55 = vcombine.low %v171_v24, %v178_v47  ;;  %v250_v56 = vadd.f32 %v249_v49, %v248_v43  ;;  %v263_v57 = vrot.slane %v262_v50, 2  ;;  %v288_v58 = vsel %vm82_vm0, %v235_v31, 0.0 }
  0x35   :  { %v257_v59 = vadd.f32 %v256_v51, %v255_v44  ;;  %v270_v60 = vrot.slane %v269_v52, 2  ;;  %v276_v61 = vadd.f32 %v275_v53, %v274_v25  ;;  %v283_v62 = vadd.f32 %v282_v54, %v281_v46 }
  0x36   :  { %v194_v63 = vrot.slane %v180_v55, %v507_v15  ;;  %v251_v0 = vrot.slane %v250_v56, 1  ;;  %v264_v1 = vadd.f32 %v263_v57, %v262_v50  ;;  %v289_v2 = vrot.slane %v288_v58, 4 }
  0x37   :  { %v258_v3 = vrot.slane %v257_v59, 1  ;;  %v271_v4 = vadd.f32 %v270_v60, %v269_v52  ;;  %v277_v5 = vrot.slane %v276_v61, 2  ;;  %v284_v6 = vrot.slane %v283_v62, 2 }
  0x38   :  { %v195_v8 = vcombine.low %v187_v48, %v194_v63  ;;  %v252_v9 = vadd.f32 %v251_v0, %v250_v56  ;;  %v265_v10 = vrot.slane %v264_v1, 1  ;;  %v290_v11 = vadd.f32 %v289_v2, %v288_v58 }
  0x39   :  { %v259_v12 = vadd.f32 %v258_v3, %v257_v59  ;;  %v272_v13 = vrot.slane %v271_v4, 1  ;;  %v278_v14 = vadd.f32 %v277_v5, %v276_v61  ;;  %v285_v16 = vadd.f32 %v284_v6, %v283_v62 }
  0x3a   :  { %v266_v18 = vadd.f32 %v265_v10, %v264_v1  ;;  %v291_v19 = vrot.slane %v290_v11, 2  ;;  %v295_v20 = vsel %vm82_vm0, %v237_v38, 0.0  ;;  %198 = vst [vmem:[#allocation5] sm:$0xff] %v195_v8 }
  0x3b   :  { %v273_v21 = vadd.f32 %v272_v13, %v271_v4  ;;  %v279_v22 = vrot.slane %v278_v14, 1  ;;  %v286_v23 = vrot.slane %v285_v16, 1  ;;  %v296_v26 = vrot.slane %v295_v20, 4 }
  0x3c   :  { %v292_v27 = vadd.f32 %v291_v19, %v290_v11 }
  0x3d   :  { %v297_v28 = vadd.f32 %v296_v26, %v295_v20 }
  0x3e   :  { %432 = shalt.err (!%p429_p12)
}
  0x3f   :  { %s433_s25 = scalar_lea.hbm %s578_s1, 128 }
  0x40   :  { %p434_p13 = scmp.ne.s32.totalorder %s578_s1, %s433_s25  ;;  %p437_p0 = scmp.lt.u32.totalorder %s433_s25, %s578_s1 }
  0x42   :  { %p439_p1 = pnand %p437_p0, %p434_p13 }
  0x44   :  { %442 = shalt.err (!%p439_p1)
}
  0x45   :  { %371 = dma.vmem_to_hbm [thread:$0]  %s369_s21, 128, %s578_s1, [#allocation4]   ;;  %v280_v29 = vadd.f32 %v279_v22, %v278_v14  ;;  %v310_v30 = vcombine.low %v252_v9, %v259_v12  ;;  %v287_v24 = vadd.f32 %v286_v23, %v285_v16  ;;  %v293_v31 = vrot.slane %v292_v27, 1 }
  0x46   :  { %v298_v32 = vrot.slane %v297_v28, 2  ;;  %v311_v33 = vcombine.low %v266_v18, %v273_v21  ;;  %s475_s1 = smov [#allocation6]  }
  0x47   :  { %v320_v35 = vrot.slane %v310_v30, %v507_v15  ;;  %v294_v36 = vadd.f32 %v293_v31, %v292_v27  ;;  %v312_v38 = vcombine.low %v280_v29, %v287_v24  ;;  %s378_s4 = sshll.u32 %s475_s1, 4  ;;  %s379_s4 = int_to_ptr.vmem [resolvable:$true] %s378_s4 }
  0x48   :  { %v299_v34 = vadd.f32 %v298_v32, %v297_v28  ;;  %v327_v39 = vrot.slane %v311_v33, %v507_v15  ;;  %s443_s5 = scalar_lea.vmem %s379_s4, 128  ;;  %p448_p3 = scmp.lt.s32.totalorder %s379_s4, %s379_s4 }
  0x49   :  { %v334_v41 = vrot.slane %v312_v38, %v507_v15  ;;  %p444_p2 = scmp.ne.s32.totalorder %s379_s4, %s443_s5  ;;  %p449_p4 = scmp.lt.s32.totalorder %s443_s5, %s443_s5 }
  0x4a   :  { %v300_v37 = vrot.slane %v299_v34, 1  ;;  %v342_v42 = vcombine.low %v320_v35, %v327_v39 }
  0x4b   :  { %p450_p5 = por %p449_p4, %p448_p3 }
  0x4c   :  { %v301_v40 = vadd.f32 %v300_v37, %v299_v34  ;;  %v350_v44 = vrot.slane %v342_v42, %v507_v15 }
  0x4d   :  { %p451_p6 = pnand %p450_p5, %p444_p2 }
  0x4e   :  { %v313_v17 = vcombine.low %v294_v36, %v301_v40 }
  0x50   :  { %v341_v43 = vrot.slane %v313_v17, %v507_v15 }
  0x52   :  { %v343_v7 = vcombine.low %v334_v41, %v341_v43 }
  0x54   :  { %v357_v45 = vrot.slane %v343_v7, %v507_v15 }
  0x56   :  { %v358_v25 = vcombine.low %v350_v44, %v357_v45 }
  0x58   :  { %361 = vst [vmem:[#allocation6] sm:$0xff] %v358_v25 }
  0x59   :  { %454 = shalt.err (!%p451_p6)
}
  0x5a   :  { %s455_s8 = scalar_lea.hbm %s579_s2, 128 }
  0x5b   :  { %p456_p7 = scmp.ne.s32.totalorder %s579_s2, %s455_s8  ;;  %p459_p8 = scmp.lt.u32.totalorder %s455_s8, %s579_s2 }
  0x5d   :  { %p461_p9 = pnand %p459_p8, %p456_p7 }
  0x5f   :  { %464 = shalt.err (!%p461_p9)
}
  0x60   :  { %381 = dma.vmem_to_hbm [thread:$0]  %s379_s4, 128, %s579_s2, [#allocation7]  }
  0x61   :  { %467 = dma.done.wait [#allocation4], 128  }
  0x62   :  { %468 = vsyncadd [#allocation4], 4294967168 }
  0x63   :  { %469 = dma.done.wait [#allocation7], 128  }
  0x64   :  { %470 = vsyncadd [#allocation7], 4294967168 }
  0x65   :  { %388 = vsyncpa [#allocation3], 1 }
  0x66   :  { %389 = vsyncpa [#allocation4], 1 }
  0x67   :  { %390 = vsyncpa [#allocation7], 1 }

</bundles_post_ra>
